<compile_context>
chip_gen: v7x
topology: tpu7x:2x2x1
jax: 0.10.0
libtpu: 0.0.40
codegen_flags: <defaults>
</compile_context>

<pallas_src>
import jax
import jax.numpy as jnp
from jax.experimental import pallas as pl
from jax.experimental.pallas import tpu as pltpu


def _spe_add_kernel(x_ref, emb_ref, o_ref):
    # x_ref / o_ref: (bblk, nblk, T*F); emb_ref: (nblk, T*F)
    # Leading-axis broadcast only (no sublane/lane relayout): pure VPU add.
    o_ref[...] = x_ref[...] + emb_ref[...][None, :, :]


def spatial_positional_encoding(
    x,
    embedding_weight,
    *,
    target_block_bytes=3 << 20,      # ~3 MiB slabs: near HBM roofline, fits every gen
    donate_x=False,                  # alias x -> out (halves activation HBM footprint)
    xla_fallback_below_bytes=None,   # e.g. 256<<10: let XLA fuse tiny inputs instead
):
    """x: (B, N, T, F); embedding_weight: (N, F). Returns (B, N, T, F)."""
    B, N, T, F = x.shape
    assert embedding_weight.shape == (N, F)
    TF = T * F
    itemsize = jnp.dtype(x.dtype).itemsize
    total_bytes = B * N * TF * itemsize

    if xla_fallback_below_bytes is not None and total_bytes < xla_fallback_below_bytes:
        # Tiny input: fused XLA broadcast-add beats pallas_call fixed overhead.
        return x + embedding_weight[None, :, None, :].astype(x.dtype)

    # Lane-dense layout: collapse (T, F) -> T*F (contiguous reshape, free).
    x2 = x.reshape(B, N, TF)

    # Pre-broadcast over T and pre-cast once in the wrapper:
    # emb2[n, t*F + f] == embedding_weight[n, f].
    emb2 = jnp.tile(embedding_weight.astype(x.dtype), (1, T))  # (N, T*F)

    # ---------------- tiling policy ----------------
    bytes_per_batch = N * TF * itemsize
    bytes_per_row = TF * itemsize
    if bytes_per_batch <= target_block_bytes:
        # Fuse several batches into one slab; keep the whole (N, T*F) plane.
        bblk = min(B, max(1, target_block_bytes // bytes_per_batch))
        nblk = N
    else:
        # One batch plane is too big: split along N.  nblk is a multiple of 8
        # (or the full N when N < 8) to satisfy the sublane constraint; the
        # cdiv grid pads/masks the tail block, which is safe for elementwise.
        bblk = 1
        rows = target_block_bytes // max(1, bytes_per_row)
        nblk = N if N < 8 else min(N, max(8, (rows // 8) * 8))

    grid_b = pl.cdiv(B, bblk)
    grid_n = pl.cdiv(N, nblk)
    slab_bytes = bblk * nblk * TF * itemsize

    # v7x megacore: only force a batch split when the resulting slab stays
    # large enough to be worth the extra pipeline step; tiny problems run as
    # a single grid step (per-step overhead dominates otherwise).
    if grid_b * grid_n == 1 and B >= 2 and slab_bytes >= (2 << 20):
        bblk = pl.cdiv(B, 2)             # exactly 2 even-ish steps
        grid_b = pl.cdiv(B, bblk)
        slab_bytes = bblk * nblk * TF * itemsize

    grid = (grid_b, grid_n)

    # Scoped-VMEM budget: 2x input + 2x output slabs (double buffering) +
    # double-buffered emb block + margin.  Cap at 48 MiB so v7x's 64 MiB
    # physical VMEM is respected; floor at 32 MiB to clear v5e's 16 MiB
    # default scoped limit.
    emb_block_bytes = nblk * TF * itemsize
    needed = 4 * slab_bytes + 2 * emb_block_bytes + (2 << 20)
    vmem_limit = max(32 << 20, min(48 << 20, needed))
    vmem_limit = max(vmem_limit, needed)  # never below what the pipeline needs

    out2 = pl.pallas_call(
        _spe_add_kernel,
        out_shape=jax.ShapeDtypeStruct((B, N, TF), x.dtype),
        grid_spec=pl.GridSpec(
            grid=grid,
            in_specs=[
                pl.BlockSpec((bblk, nblk, TF), lambda b, n: (b, n, 0)),
                # Follows the N split.  When nblk == N the block index is a
                # constant (0, 0), so the pipeline keeps the table resident
                # in VMEM and does not re-DMA it between grid steps.
                pl.BlockSpec((nblk, TF), lambda b, n: (n, 0)),
            ],
            out_specs=pl.BlockSpec((bblk, nblk, TF), lambda b, n: (b, n, 0)),
        ),
        compiler_params=pltpu.CompilerParams(
            dimension_semantics=("parallel", "parallel"),
            vmem_limit_bytes=int(vmem_limit),
        ),
        input_output_aliases=({0: 0} if donate_x else {}),
    )(x2, emb2)

    # TODO(synk): training-mode dropout not implemented (inference identity);
    # gcn_smooth_layers is None in the default construction -> no-op.
    return out2.reshape(B, N, T, F)


def spatial_positional_encoding_ref(x, embedding_weight):
    # Pure-JAX reference for correctness checking.
    return x + embedding_weight[None, :, None, :].astype(x.dtype)


if __name__ == "__main__":
    key = jax.random.PRNGKey(0)

    # --- Test 1: module-scale shapes (B=2, N=16, T=8, F=d_model=32), f32.
    #     Tiny input -> single grid step, whole-plane block, resident emb.
    B, N, T, F = 2, 16, 8, 32
    k1, k2, k3, k4 = jax.random.split(key, 4)
    x = jax.random.normal(k1, (B, N, T, F), dtype=jnp.float32)
    w = jax.random.normal(k2, (N, F), dtype=jnp.float32)

    out = spatial_positional_encoding(x, w)
    out = jax.block_until_ready(out)
    ref = spatial_positional_encoding_ref(x, w)
    assert out.shape == (B, N, T, F)
    assert jnp.allclose(out, ref, atol=1e-6, rtol=1e-6)

    # --- Test 2: exercise the N-split + cdiv tail-block path with a small
    #     explicit slab target (bf16, awkward B=3, N=40 not a multiple of 32).
    B2, N2, T2, F2 = 3, 40, 8, 128
    x2 = jax.random.normal(k3, (B2, N2, T2, F2), dtype=jnp.bfloat16)
    w2 = jax.random.normal(k4, (N2, F2), dtype=jnp.bfloat16)

    out2 = spatial_positional_encoding(x2, w2, target_block_bytes=64 << 10)
    out2 = jax.block_until_ready(out2)
    ref2 = spatial_positional_encoding_ref(x2, w2)
    assert out2.shape == (B2, N2, T2, F2)
    assert jnp.allclose(out2.astype(jnp.float32), ref2.astype(jnp.float32),
                        atol=1e-2, rtol=1e-2)

    print("KERNEL_OK")
</pallas_src>

<mosaic_0001>
module attributes {stable_mosaic.version = 11 : i64} {
  func.func @_spe_add_kernel(%arg0: i32, %arg1: i32, %arg2: memref<2x16x256xf32, #tpu.memory_space<vmem>>, %arg3: memref<16x256xf32, #tpu.memory_space<vmem>>, %arg4: memref<2x16x256xf32, #tpu.memory_space<vmem>>) attributes {dimension_semantics = [#tpu.dimension_semantics<parallel>, #tpu.dimension_semantics<parallel>], iteration_bounds = array<i64: 1, 1>, scalar_prefetch = 0 : i64, scratch_operands = 0 : i64, tpu.core_type = #tpu.core_type<tc>, window_params = [{transform_indices = @transform_0, window_bounds = array<i64: 2, 16, 256>}, {transform_indices = @transform_1, window_bounds = array<i64: 16, 256>}, {transform_indices = @transform_2, window_bounds = array<i64: 2, 16, 256>}]} {
    %c0 = arith.constant 0 : index
    %c0_0 = arith.constant 0 : index
    %c0_1 = arith.constant 0 : index
    %0 = vector.load %arg2[%c0, %c0_0, %c0_1] : memref<2x16x256xf32, #tpu.memory_space<vmem>>, vector<2x16x256xf32>
    %c0_2 = arith.constant 0 : index
    %c0_3 = arith.constant 0 : index
    %1 = vector.load %arg3[%c0_2, %c0_3] : memref<16x256xf32, #tpu.memory_space<vmem>>, vector<16x256xf32>
    %2 = vector.shape_cast %1 : vector<16x256xf32> to vector<1x16x256xf32>
    %3 = vector.broadcast %2 : vector<1x16x256xf32> to vector<2x16x256xf32>
    %4 = arith.addf %0, %3 : vector<2x16x256xf32>
    %c0_4 = arith.constant 0 : index
    %c0_5 = arith.constant 0 : index
    %c0_6 = arith.constant 0 : index
    %5 = vector.load %arg4[%c0_4, %c0_5, %c0_6] : memref<2x16x256xf32, #tpu.memory_space<vmem>>, vector<2x16x256xf32>
    tpu.vector_store %arg4[%c0_4, %c0_5, %c0_6], %4 {strides = array<i32>} : memref<2x16x256xf32, #tpu.memory_space<vmem>>, vector<2x16x256xf32>,
    return
  }
  func.func @transform_0(%arg0: i32, %arg1: i32) -> (i32, i32, i32) {
    %c0_i32 = arith.constant 0 : i32
    %c0_i32_0 = arith.constant 0 : i32
    return %arg0, %arg1, %c0_i32 : i32, i32, i32
  }
  func.func @transform_1(%arg0: i32, %arg1: i32) -> (i32, i32) {
    %c0_i32 = arith.constant 0 : i32
    %c0_i32_0 = arith.constant 0 : i32
    return %arg1, %c0_i32 : i32, i32
  }
  func.func @transform_2(%arg0: i32, %arg1: i32) -> (i32, i32, i32) {
    %c0_i32 = arith.constant 0 : i32
    %c0_i32_0 = arith.constant 0 : i32
    return %arg0, %arg1, %c0_i32 : i32, i32, i32
  }
}

</mosaic_0001>

<bundles_post_ra>
// kernel: tpu_custom_call.1
= control target key start
LH: loop header
LB: loop body
LE: loop exit
PB: predicated region body
PF: predicated region fallthrough
CT: control target
= control target key end

     0   :  { %7 = vsyncpa [#allocation3], 0  ;;  %s228_s0 = inlined_call_operand.hbm [shape: f32[2,16,256], index: 0, kind: input, shape index: {}]   ;;  %s229_s1 = inlined_call_operand.hbm [shape: f32[16,256], index: 1, kind: input, shape index: {}]   ;;  %s230_s2 = inlined_call_operand.hbm [shape: f32[2,16,256], index: 2, kind: output, shape index: {}]  }
   0x1   :  { %8 = vsyncpa [#allocation6], 0 }
   0x2   :  { %9 = vsyncpa [#allocation4], 0  ;;  %s163_s9 = smov [#allocation2]   ;;  %s91_s13 = scalar_lea.hbm %s228_s0, 1024 }
   0x3   :  { %s15_s10 = sshll.u32 %s163_s9, 4  ;;  %p92_p0 = scmp.ne.s32.totalorder %s228_s0, %s91_s13  ;;  %s16_s10 = int_to_ptr.vmem [resolvable:$true] %s15_s10 }
   0x4   :  { %p95_p1 = scmp.lt.u32.totalorder %s91_s13, %s228_s0 }
   0x6   :  { %p97_p2 = pnand %p95_p1, %p92_p0 }
   0x8   :  { %100 = shalt.err (!%p97_p2)
}
   0x9   :  { %s101_s18 = scalar_lea.vmem %s16_s10, 1024  ;;  %p106_p4 = scmp.lt.s32.totalorder %s16_s10, %s16_s10 }
   0xa   :  { %p102_p3 = scmp.ne.s32.totalorder %s16_s10, %s101_s18  ;;  %p107_p5 = scmp.lt.s32.totalorder %s101_s18, %s101_s18 }
   0xc   :  { %p108_p6 = por %p107_p5, %p106_p4 }
   0xe   :  { %p109_p7 = pnand %p108_p6, %p102_p3 }
  0x10   :  { %112 = shalt.err (!%p109_p7)
}
  0x11   :  { %s164_s19 = smov 256   ;;  %s165_s20 = smov 16  }
  0x12   :  { %21 = dma.hbm_to_vmem [thread:$0]  %s228_s0, 1024, %s16_s10, [#allocation3], %s164_s19, %s164_s19, %s165_s20  }
  0x13   :  { %s166_s23 = smov [#allocation5]   ;;  %s113_s27 = scalar_lea.hbm %s229_s1, 512 }
  0x14   :  { %s27_s24 = sshll.u32 %s166_s23, 4  ;;  %p114_p8 = scmp.ne.s32.totalorder %s229_s1, %s113_s27  ;;  %s28_s24 = int_to_ptr.vmem [resolvable:$true] %s27_s24 }
  0x15   :  { %p117_p9 = scmp.lt.u32.totalorder %s113_s27, %s229_s1 }
  0x17   :  { %p119_p10 = pnand %p117_p9, %p114_p8 }
  0x19   :  { %122 = shalt.err (!%p119_p10)
}
  0x1a   :  { %s123_s4 = scalar_lea.vmem %s28_s24, 512  ;;  %p128_p12 = scmp.lt.s32.totalorder %s28_s24, %s28_s24 }
  0x1b   :  { %p124_p11 = scmp.ne.s32.totalorder %s28_s24, %s123_s4  ;;  %p129_p13 = scmp.lt.s32.totalorder %s123_s4, %s123_s4 }
  0x1d   :  { %p130_p0 = por %p129_p13, %p128_p12 }
  0x1f   :  { %p131_p1 = pnand %p130_p0, %p124_p11 }
  0x21   :  { %134 = shalt.err (!%p131_p1)
}
  0x22   :  { %33 = dma.hbm_to_vmem [thread:$0]  %s229_s1, 512, %s28_s24, [#allocation6], %s164_s19, %s164_s19, %s165_s20  }
  0x23   :  { %157 = dma.done.wait [#allocation3], 1024  }
  0x24   :  { %158 = vsyncadd [#allocation3], 4294966272 }
  0x25   :  { %159 = dma.done.wait [#allocation6], 512  }
  0x26   :  { %160 = vsyncadd [#allocation6], 4294966784  ;;  %v40_v0 = vld [vmem:[#allocation2] sm:$0xff]  ;;  %v41_v2 = vld [vmem:[#allocation2 + $0x8] sm:$0xff]  ;;  %s167_s6 = smov [#allocation7]  }
  0x27   :  { %v48_v1 = vld [vmem:[#allocation5] sm:$0xff]  ;;  %v49_v4 = vld [vmem:[#allocation5 + $0x8] sm:$0xff]  ;;  %v42_v5 = vld [vmem:[#allocation2 + $0x10] sm:$0xff]  ;;  %s73_s7 = sshll.u32 %s167_s6, 4  ;;  %s74_s7 = int_to_ptr.vmem [resolvable:$true] %s73_s7 }
  0x28   :  { %v52_v3 = vadd.f32 %v48_v1, %v40_v0  ;;  %v50_v6 = vld [vmem:[#allocation5 + $0x10] sm:$0xff]  ;;  %v53_v7 = vadd.f32 %v49_v4, %v41_v2  ;;  %v43_v9 = vld [vmem:[#allocation2 + $0x18] sm:$0xff]  ;;  %v44_v11 = vld [vmem:[#allocation2 + $0x20] sm:$0xff]  ;;  %s135_s1 = scalar_lea.vmem %s74_s7, 1024  ;;  %p140_p3 = scmp.lt.s32.totalorder %s74_s7, %s74_s7 }
  0x29   :  { %v54_v8 = vadd.f32 %v50_v6, %v42_v5  ;;  %v51_v10 = vld [vmem:[#allocation5 + $0x18] sm:$0xff]  ;;  %v56_v13 = vadd.f32 %v48_v1, %v44_v11  ;;  %v45_v14 = vld [vmem:[#allocation2 + $0x28] sm:$0xff]  ;;  %v46_v15 = vld [vmem:[#allocation2 + $0x30] sm:$0xff]  ;;  %p136_p2 = scmp.ne.s32.totalorder %s74_s7, %s135_s1  ;;  %p141_p4 = scmp.lt.s32.totalorder %s135_s1, %s135_s1 }
  0x2a   :  { %60 = vst [vmem:[#allocation7] sm:$0xff] %v52_v3  ;;  %v55_v12 = vadd.f32 %v51_v10, %v43_v9  ;;  %v47_v16 = vld [vmem:[#allocation2 + $0x38] sm:$0xff]  ;;  %61 = vst [vmem:[#allocation7 + $0x8] sm:$0xff] %v53_v7  ;;  %v57_v17 = vadd.f32 %v49_v4, %v45_v14  ;;  %v58_v18 = vadd.f32 %v50_v6, %v46_v15 }
  0x2b   :  { %62 = vst [vmem:[#allocation7 + $0x10] sm:$0xff] %v54_v8  ;;  %v59_v19 = vadd.f32 %v51_v10, %v47_v16  ;;  %64 = vst [vmem:[#allocation7 + $0x20] sm:$0xff] %v56_v13  ;;  %p142_p5 = por %p141_p4, %p140_p3 }
  0x2c   :  { %63 = vst [vmem:[#allocation7 + $0x18] sm:$0xff] %v55_v12  ;;  %65 = vst [vmem:[#allocation7 + $0x28] sm:$0xff] %v57_v17 }
  0x2d   :  { %66 = vst [vmem:[#allocation7 + $0x30] sm:$0xff] %v58_v18  ;;  %67 = vst [vmem:[#allocation7 + $0x38] sm:$0xff] %v59_v19  ;;  %p143_p6 = pnand %p142_p5, %p136_p2 }
  0x2f   :  { %146 = shalt.err (!%p143_p6)
}
  0x30   :  { %s147_s10 = scalar_lea.hbm %s230_s2, 1024 }
  0x31   :  { %p148_p7 = scmp.ne.s32.totalorder %s230_s2, %s147_s10  ;;  %p151_p8 = scmp.lt.u32.totalorder %s147_s10, %s230_s2 }
  0x33   :  { %p153_p9 = pnand %p151_p8, %p148_p7 }
  0x35   :  { %156 = shalt.err (!%p153_p9)
}
  0x36   :  { %79 = dma.vmem_to_hbm [thread:$0]  %s74_s7, 1024, %s230_s2, [#allocation4], %s164_s19, %s164_s19, %s165_s20  }
  0x37   :  { %161 = dma.done.wait [#allocation4], 1024  }
  0x38   :  { %162 = vsyncadd [#allocation4], 4294966272 }
  0x39   :  { %83 = vsyncpa [#allocation3], 1 }
  0x3a   :  { %84 = vsyncpa [#allocation6], 1 }
  0x3b   :  { %85 = vsyncpa [#allocation4], 1 }

</bundles_post_ra>
